<compile_context>
chip_gen: v5e
topology: v5e:2x2
jax: 0.10.0
libtpu: 0.0.40
codegen_flags: <defaults>
</compile_context>

<pallas_src>
import functools
import math

import jax
import jax.numpy as jnp
from jax.experimental import pallas as pl
from jax.experimental.pallas import tpu as pltpu


# ----------------------------- init-time buffer -----------------------------

def make_positional_encoding(d_model: int, max_len: int, dtype=jnp.float32) -> jnp.ndarray:
    """Sinusoidal pe buffer, shape (max_len, d_model), in the model dtype.

    Equivalent to the PyTorch module's `pe` buffer with the size-1 batch dim
    squeezed out (the kernel re-broadcasts over batch).  Odd d_model is
    handled (cos columns = d_model // 2).
    """
    position = jnp.arange(0, max_len, dtype=jnp.float32)[:, None]                  # (L, 1)
    div_term = jnp.exp(
        jnp.arange(0, d_model, 2, dtype=jnp.float32) * (-math.log(10000.0) / d_model)
    )                                                                               # (ceil(D/2),)
    angles = position * div_term                                                    # (L, ceil(D/2))
    pe = jnp.zeros((max_len, d_model), dtype=jnp.float32)
    pe = pe.at[:, 0::2].set(jnp.sin(angles))
    pe = pe.at[:, 1::2].set(jnp.cos(angles[:, : d_model // 2]))
    return pe.astype(dtype)


# --------------------------------- kernels ----------------------------------

def _add_pe_3d_kernel(x_ref, pe_ref, o_ref):
    # x_ref / o_ref: (ts, B, D); pe_ref: (ts, D).
    # Batch broadcast happens in-register -> pe HBM read stays at S*D.
    o_ref[...] = (x_ref[...] + pe_ref[...][:, None, :]).astype(o_ref.dtype)


def _add_pe_flat_kernel(x_ref, pe_ref, o_ref, *, batch):
    # x_ref / o_ref: (ts, B*D); pe_ref: (ts, D).
    # Lane-tile pe `batch` times in-register so the store is one wide dense slab
    # and pe HBM traffic stays at S*D (no wrapper-side broadcast_to materialization).
    pe = pe_ref[...]
    if batch > 1:
        pe = jnp.concatenate([pe] * batch, axis=-1)
    o_ref[...] = (x_ref[...] + pe).astype(o_ref.dtype)


# ------------------------------ tiling helpers ------------------------------

def _sublane(itemsize: int) -> int:
    return 8 * max(1, 4 // max(itemsize, 1))   # 8 for f32, 16 for bf16, 32 for int8


def _round_up(x: int, m: int) -> int:
    return ((x + m - 1) // m) * m


def _target_block_bytes() -> int:
    # ~1 MiB blocks already hit ~85% of the HBM add roofline, so size per
    # generation only to (a) stay under the scoped-VMEM default with
    # double-buffered x+out+pe (16 MiB on v5e, 32 MiB on v6e/v7x) and
    # (b) keep the ~0.35us per-step pipeline overhead negligible on v7x's
    # ~3.2 TB/s HBM.
    try:
        kind = jax.devices()[0].device_kind.lower()
    except Exception:
        kind = ""
    if "v5 lite" in kind or "v5e" in kind or "v5lite" in kind:
        return 2 << 20
    if "v7" in kind:
        return 6 << 20
    return 4 << 20


def _pick_seq_tile(seq_len: int, row_bytes: int, sub: int, target_bytes: int) -> int:
    """Sublane-aligned seq tile sized to ~target_bytes per x block."""
    ts = max(target_bytes // max(row_bytes, 1), 1)
    ts = max((ts // sub) * sub, sub)
    ts = min(ts, seq_len)
    # Nudge toward an even number of grid steps (>= 2) so v7x's two TensorCores
    # split the "parallel" seq axis evenly; harmless no-op on v5e/v6e (1 TC).
    if seq_len > sub:
        steps = -(-seq_len // ts)
        if steps % 2 == 1:
            cand = min(_round_up(-(-seq_len // (steps + 1)), sub), seq_len)
            if cand >= sub and (-(-seq_len // cand)) % 2 == 0:
                ts = cand
    return ts


# --------------------------------- forward ----------------------------------

def positional_encoding_forward(x: jnp.ndarray, pe: jnp.ndarray) -> jnp.ndarray:
    """x: (seq_len, batch, d_model); pe: (max_len, d_model) precomputed in x's dtype.

    Returns x + pe[:seq_len, None, :]  (identical to the PyTorch forward; the
    result is a new array, x is not written in place).
    """
    seq_len, batch, d_model = x.shape
    if pe.ndim == 3:                       # also accept the PyTorch-style (L, 1, D) buffer
        pe = pe.reshape(pe.shape[0], pe.shape[-1])
    if pe.dtype != x.dtype:                # normally precomputed in the model dtype at init
        pe = pe.astype(x.dtype)

    itemsize = jnp.dtype(x.dtype).itemsize
    sub = _sublane(itemsize)
    row_bytes = batch * d_model * itemsize
    ts = _pick_seq_tile(seq_len, row_bytes, sub, _target_block_bytes())
    grid = (pl.cdiv(seq_len, ts),)
    cparams = pltpu.CompilerParams(dimension_semantics=("parallel",))
    # pe is (max_len, d_model); the grid only ever touches rows [0, seq_len).
    pe_spec = pl.BlockSpec((ts, d_model), lambda i: (i, 0))

    if d_model % 128 == 0 and batch % sub == 0:
        # Dense 3-D layout: (batch, d_model) fill (sublane, lane) exactly, no padding.
        return pl.pallas_call(
            _add_pe_3d_kernel,
            out_shape=jax.ShapeDtypeStruct((seq_len, batch, d_model), x.dtype),
            grid=grid,
            in_specs=[
                pl.BlockSpec((ts, batch, d_model), lambda i: (i, 0, 0)),
                pe_spec,
            ],
            out_specs=pl.BlockSpec((ts, batch, d_model), lambda i: (i, 0, 0)),
            compiler_params=cparams,
        )(x, pe)

    # General path (small / unaligned batch or d_model): flatten (batch, d_model)
    # into the lane dim (free, contiguous reshape) so x/out blocks are dense and
    # stores are wide; pe stays (max_len, d_model) in HBM and is broadcast over
    # batch inside the kernel.
    x2 = x.reshape(seq_len, batch * d_model)
    out2 = pl.pallas_call(
        functools.partial(_add_pe_flat_kernel, batch=batch),
        out_shape=jax.ShapeDtypeStruct((seq_len, batch * d_model), x.dtype),
        grid=grid,
        in_specs=[
            pl.BlockSpec((ts, batch * d_model), lambda i: (i, 0)),
            pe_spec,
        ],
        out_specs=pl.BlockSpec((ts, batch * d_model), lambda i: (i, 0)),
        compiler_params=cparams,
    )(x2, pe)
    return out2.reshape(seq_len, batch, d_model)


# ----------------------------------- main -----------------------------------

if __name__ == "__main__":
    key = jax.random.PRNGKey(0)
    k1, k2, k3 = jax.random.split(key, 3)

    # Case 1: small unaligned d_model (32), small batch -> flattened lane path.
    d_model, max_len, seq_len, batch = 32, 16, 8, 2
    x = jax.random.normal(k1, (seq_len, batch, d_model), dtype=jnp.float32)
    pe = make_positional_encoding(d_model, max_len, x.dtype)
    ref = x + pe[:seq_len][:, None, :]
    out = jax.block_until_ready(positional_encoding_forward(x, pe))
    assert out.shape == x.shape
    assert jnp.allclose(out, ref, atol=1e-6), "mismatch vs reference (D=32, B=2)"

    # Case 2: lane-aligned d_model (128) but small batch -> flattened path (B*D=256).
    d_model, max_len, seq_len, batch = 128, 32, 16, 2
    x = jax.random.normal(k2, (seq_len, batch, d_model), dtype=jnp.float32)
    pe = make_positional_encoding(d_model, max_len, x.dtype)
    ref = x + pe[:seq_len][:, None, :]
    out = jax.block_until_ready(positional_encoding_forward(x, pe))
    assert out.shape == x.shape
    assert jnp.allclose(out, ref, atol=1e-6), "mismatch vs reference (D=128, B=2)"

    # Case 3: lane-aligned d_model and sublane-aligned batch -> dense 3-D path.
    d_model, max_len, seq_len, batch = 128, 32, 16, 8
    x = jax.random.normal(k3, (seq_len, batch, d_model), dtype=jnp.float32)
    pe = make_positional_encoding(d_model, max_len, x.dtype)
    ref = x + pe[:seq_len][:, None, :]
    out = jax.block_until_ready(positional_encoding_forward(x, pe))
    assert out.shape == x.shape
    assert jnp.allclose(out, ref, atol=1e-6), "mismatch vs reference (D=128, B=8)"

    print("KERNEL_OK")
</pallas_src>

<mosaic_0001>
module attributes {stable_mosaic.version = 11 : i64} {
  func.func @_add_pe_flat_kernel(%arg0: i32, %arg1: memref<8x64xf32, #tpu.memory_space<vmem>>, %arg2: memref<8x32xf32, #tpu.memory_space<vmem>>, %arg3: memref<8x64xf32, #tpu.memory_space<vmem>>) attributes {dimension_semantics = [#tpu.dimension_semantics<parallel>], iteration_bounds = array<i64: 1>, scalar_prefetch = 0 : i64, scratch_operands = 0 : i64, tpu.core_type = #tpu.core_type<tc>, window_params = [{transform_indices = @transform_0, window_bounds = array<i64: 8, 64>}, {transform_indices = @transform_1, window_bounds = array<i64: 8, 32>}, {transform_indices = @transform_2, window_bounds = array<i64: 8, 64>}]} {
    %c0 = arith.constant 0 : index
    %c0_0 = arith.constant 0 : index
    %0 = vector.load %arg2[%c0, %c0_0] : memref<8x32xf32, #tpu.memory_space<vmem>>, vector<8x32xf32>
    %1 = tpu.concatenate %0, %0 in 1 : vector<8x32xf32>, vector<8x32xf32> -> vector<8x64xf32>
    %c0_1 = arith.constant 0 : index
    %c0_2 = arith.constant 0 : index
    %2 = vector.load %arg1[%c0_1, %c0_2] : memref<8x64xf32, #tpu.memory_space<vmem>>, vector<8x64xf32>
    %3 = arith.addf %2, %1 : vector<8x64xf32>
    %c0_3 = arith.constant 0 : index
    %c0_4 = arith.constant 0 : index
    %4 = vector.load %arg3[%c0_3, %c0_4] : memref<8x64xf32, #tpu.memory_space<vmem>>, vector<8x64xf32>
    tpu.vector_store %arg3[%c0_3, %c0_4], %3 {strides = array<i32>} : memref<8x64xf32, #tpu.memory_space<vmem>>, vector<8x64xf32>,
    return
  }
  func.func @transform_0(%arg0: i32) -> (i32, i32) {
    %c0_i32 = arith.constant 0 : i32
    %c0_i32_0 = arith.constant 0 : i32
    return %arg0, %c0_i32 : i32, i32
  }
  func.func @transform_1(%arg0: i32) -> (i32, i32) {
    %c0_i32 = arith.constant 0 : i32
    %c0_i32_0 = arith.constant 0 : i32
    return %arg0, %c0_i32 : i32, i32
  }
  func.func @transform_2(%arg0: i32) -> (i32, i32) {
    %c0_i32 = arith.constant 0 : i32
    %c0_i32_0 = arith.constant 0 : i32
    return %arg0, %c0_i32 : i32, i32
  }
}

</mosaic_0001>

<bundles_post_ra>
// kernel: tpu_custom_call.1
= control target key start
LH: loop header
LB: loop body
LE: loop exit
PB: predicated region body
PF: predicated region fallthrough
CT: control target
= control target key end

     0   :  { %7 = vsyncpa [#allocation3], 0  ;;  %s179_s0 = inlined_call_operand.hbm [shape: f32[8,64], index: 0, kind: input, shape index: {}]   ;;  %s180_s1 = inlined_call_operand.hbm [shape: f32[16,32], index: 1, kind: input, shape index: {}]   ;;  %s181_s2 = inlined_call_operand.hbm [shape: f32[8,64], index: 2, kind: output, shape index: {}]  }
   0x1   :  { %8 = vsyncpa [#allocation6], 0 }
   0x2   :  { %9 = vsyncpa [#allocation4], 0  ;;  %s15_s11 = sshll.u32 %s179_s0, 4  ;;  %s151_s12 = smov [#allocation2]   ;;  %s16_s11 = int_to_ptr.hbm [resolvable:$true] %s15_s11 }
   0x3   :  { %s17_s13 = sshll.u32 %s151_s12, 4  ;;  %s26_s16 = sshll.u32 %s180_s1, 4  ;;  %s18_s13 = int_to_ptr.vmem [resolvable:$true] %s17_s13  ;;  %s27_s16 = int_to_ptr.hbm [resolvable:$true] %s26_s16 }
   0x4   :  { %20 = dma.hbm_to_vmem [thread:$0]  %s16_s11, 128, %s18_s13, [#allocation3]  }
   0x5   :  { %s152_s17 = smov [#allocation5]  }
   0x6   :  { %s28_s18 = sshll.u32 %s152_s17, 4  ;;  %s29_s18 = int_to_ptr.vmem [resolvable:$true] %s28_s18 }
   0x7   :  { %31 = dma.hbm_to_vmem [thread:$0]  %s27_s16, 128, %s29_s18, [#allocation6]  }
   0x8   :  { %145 = dma.done.wait [#allocation3], 128  }
   0x9   :  { %146 = vsyncadd [#allocation3], 4294967168 }
   0xa   :  { %147 = dma.done.wait [#allocation6], 128  }
   0xb   :  { %148 = vsyncadd [#allocation6], 4294967168  ;;  %v40_v0 = vld [vmem:[#allocation5] sm:$0xff]  ;;  %s153_s0 = smov 32   ;;  %vm45_vm0 = vcmask 261120   ;;  %v47_v1 = vld [vmem:[#allocation2] sm:$0xff] }
   0xc   :  { %42 = vrot.lane.b32.xlu0 %v40_v0, %s153_s0  ;;  %s154_s19 = smov [#allocation7]   ;;  %s58_s1 = sshll.u32 %s181_s2, 4  ;;  %vm49_vm1 = vcmask 523264   ;;  %s59_s1 = int_to_ptr.hbm [resolvable:$true] %s58_s1 }
   0xd   :  { %s56_s20 = sshll.u32 %s154_s19, 4  ;;  %s57_s20 = int_to_ptr.vmem [resolvable:$true] %s56_s20 }
  0x7e   :  { %v43_v2 = vpop.permute.xlu0 %42 }
  0x7f   :  { %v46_v3 = vsel %vm45_vm0, %v40_v0, %v43_v2 }
  0x80   :  { %v48_v4 = vadd.f32 %v47_v1, %v46_v3 }
  0x82   :  { %50 = vst.msk [vmem:[#allocation7] sm:$0xff] %vm49_vm1, %v48_v4 }
  0x83   :  { %61 = dma.vmem_to_hbm [thread:$0]  %s57_s20, 128, %s59_s1, [#allocation4]  }
  0x84   :  { %149 = dma.done.wait [#allocation4], 128  }
  0x85   :  { %150 = vsyncadd [#allocation4], 4294967168 }
  0x86   :  { %66 = vsyncpa [#allocation3], 1 }
  0x87   :  { %67 = vsyncpa [#allocation6], 1 }
  0x88   :  { %68 = vsyncpa [#allocation4], 1 }

</bundles_post_ra>
